<compile_context>
chip_gen: v7x
topology: tpu7x:2x2x1
jax: 0.10.0
libtpu: 0.0.40
codegen_flags: <defaults>
</compile_context>

<pallas_src>
import functools

import jax
import jax.numpy as jnp
from jax.experimental import pallas as pl
from jax.experimental.pallas import tpu as pltpu

_MU_PAD = 128  # lane-dense output width (mu lives in column 0)


def actor_kernel(s_ref, w1_ref, b1_ref, wmu_ref, bmu_ref, mu_ref):
    # l1 = tanh(s @ W1 + b1)            -- MXU matmul, EUP tanh (f32)
    l1 = jnp.tanh(
        jnp.dot(s_ref[...], w1_ref[...], preferred_element_type=jnp.float32)
        + b1_ref[...]
    )
    # mu = tanh(l1 @ Wmu_pad + bmu_pad) * 0.1   (columns 1..127 are zeros)
    mu_ref[...] = (
        jnp.tanh(
            jnp.dot(l1, wmu_ref[...], preferred_element_type=jnp.float32)
            + bmu_ref[...]
        )
        * jnp.float32(0.1)
    ).astype(mu_ref.dtype)


def _round_up(x, m):
    return ((x + m - 1) // m) * m


@functools.partial(jax.jit, static_argnames=("block_b",))
def actor_forward(s, w1, b1, wmu, bmu, *, block_b=1024):
    """s: [B, H] float32.  Returns (mu [B,1], sigma [B,1])."""
    B, H = s.shape
    N1 = w1.shape[1]  # 32

    # Zero-pad mu_head params to a lane-dense N=128; real column is col 0.
    wmu_p = jnp.zeros((N1, _MU_PAD), jnp.float32).at[:, :1].set(wmu)
    bmu_p = jnp.zeros((1, _MU_PAD), jnp.float32).at[:, :1].set(bmu)

    # Batch tile: multiple of 8 (sublane), capped at block_b rows.
    tb = min(block_b, _round_up(B, 8))
    b_pad = _round_up(B, tb)
    if b_pad != B:
        s = jnp.pad(s, ((0, b_pad - B), (0, 0)))

    grid = (b_pad // tb,)

    mu_padded = pl.pallas_call(
        actor_kernel,
        out_shape=jax.ShapeDtypeStruct((b_pad, _MU_PAD), jnp.float32),
        grid=grid,
        in_specs=[
            pl.BlockSpec((tb, H), lambda i: (i, 0)),          # s: streamed
            pl.BlockSpec((H, N1), lambda i: (0, 0)),          # W1: resident
            pl.BlockSpec((1, N1), lambda i: (0, 0)),          # b1: resident
            pl.BlockSpec((N1, _MU_PAD), lambda i: (0, 0)),    # Wmu: resident
            pl.BlockSpec((1, _MU_PAD), lambda i: (0, 0)),     # bmu: resident
        ],
        out_specs=pl.BlockSpec((tb, _MU_PAD), lambda i: (i, 0)),
        compiler_params=pltpu.CompilerParams(
            dimension_semantics=("parallel",),
        ),
    )(s, w1, b1, wmu_p, bmu_p)

    mu = mu_padded[:B, :1]
    # sigma is a constant; no reason to emit it from the kernel.
    sigma = jnp.full((B, 1), 0.05, dtype=mu.dtype)
    return mu, sigma


def init_params(key, hidden_size):
    """Deterministic synthetic params matching nn.Linear shapes.

    torch stores Linear weight as [out, in]; we store [in, out] for x @ W.
    """
    k1, k2, k3, k4, k5, k6 = jax.random.split(key, 6)
    w1 = jax.random.normal(k1, (hidden_size, 32), jnp.float32) * 0.1
    b1 = jax.random.normal(k2, (1, 32), jnp.float32) * 0.1
    wmu = jax.random.normal(k3, (32, 1), jnp.float32) * 0.1
    bmu = jax.random.normal(k4, (1, 1), jnp.float32) * 0.1
    # sigma_head params exist in __init__ but are unused in forward().
    wsig = jax.random.normal(k5, (32, 1), jnp.float32) * 0.1
    bsig = jax.random.normal(k6, (1, 1), jnp.float32) * 0.1
    return w1, b1, wmu, bmu, wsig, bsig


if __name__ == "__main__":
    hidden_size = 32
    batch = 8

    key = jax.random.PRNGKey(0)
    kx, kp = jax.random.split(key)
    s = jax.random.normal(kx, (batch, hidden_size), jnp.float32)
    w1, b1, wmu, bmu, _wsig, _bsig = init_params(kp, hidden_size)

    mu, sigma = actor_forward(s, w1, b1, wmu, bmu)
    jax.block_until_ready((mu, sigma))

    # Reference check in plain JAX.
    l1_ref = jnp.tanh(s @ w1 + b1)
    mu_ref = jnp.tanh(l1_ref @ wmu + bmu) * 0.1
    sigma_ref = jnp.full_like(mu_ref, 0.05)
    assert mu.shape == (batch, 1) and sigma.shape == (batch, 1)
    assert jnp.allclose(mu, mu_ref, atol=1e-5)
    assert jnp.allclose(sigma, sigma_ref)

    print("KERNEL_OK")
</pallas_src>

<mosaic_0001>
module attributes {stable_mosaic.version = 11 : i64} {
  func.func @actor_kernel(%arg0: i32, %arg1: memref<8x32xf32, #tpu.memory_space<vmem>>, %arg2: memref<32x32xf32, #tpu.memory_space<vmem>>, %arg3: memref<1x32xf32, #tpu.memory_space<vmem>>, %arg4: memref<32x128xf32, #tpu.memory_space<vmem>>, %arg5: memref<1x128xf32, #tpu.memory_space<vmem>>, %arg6: memref<8x128xf32, #tpu.memory_space<vmem>>) attributes {dimension_semantics = [#tpu.dimension_semantics<parallel>], iteration_bounds = array<i64: 1>, scalar_prefetch = 0 : i64, scratch_operands = 0 : i64, tpu.core_type = #tpu.core_type<tc>, window_params = [{transform_indices = @transform_0, window_bounds = array<i64: 8, 32>}, {pipeline_mode = #tpu.pipeline_mode<synchronous>, transform_indices = @transform_1, window_bounds = array<i64: 32, 32>}, {pipeline_mode = #tpu.pipeline_mode<synchronous>, transform_indices = @transform_2, window_bounds = array<i64: 1, 32>}, {pipeline_mode = #tpu.pipeline_mode<synchronous>, transform_indices = @transform_3, window_bounds = array<i64: 32, 128>}, {pipeline_mode = #tpu.pipeline_mode<synchronous>, transform_indices = @transform_4, window_bounds = array<i64: 1, 128>}, {transform_indices = @transform_5, window_bounds = array<i64: 8, 128>}]} {
    %c0 = arith.constant 0 : index
    %c0_0 = arith.constant 0 : index
    %0 = vector.load %arg1[%c0, %c0_0] : memref<8x32xf32, #tpu.memory_space<vmem>>, vector<8x32xf32>
    %c0_1 = arith.constant 0 : index
    %c0_2 = arith.constant 0 : index
    %1 = vector.load %arg2[%c0_1, %c0_2] : memref<32x32xf32, #tpu.memory_space<vmem>>, vector<32x32xf32>
    %cst = arith.constant dense<0.000000e+00> : vector<8x32xf32>
    %2 = tpu.matmul %0, %1, %cst {dimension_numbers = #tpu.dot_dimension_numbers<[1], [0], [0], [1], [0, 0, 1, 1], [], []>} : vector<8x32xf32>, vector<32x32xf32>, vector<8x32xf32> -> vector<8x32xf32>
    %c0_3 = arith.constant 0 : index
    %c0_4 = arith.constant 0 : index
    %3 = vector.load %arg3[%c0_3, %c0_4] : memref<1x32xf32, #tpu.memory_space<vmem>>, vector<1x32xf32>
    %4 = vector.broadcast %3 : vector<1x32xf32> to vector<8x32xf32>
    %5 = arith.addf %2, %4 : vector<8x32xf32>
    %6 = math.tanh %5 : vector<8x32xf32>
    %c0_5 = arith.constant 0 : index
    %c0_6 = arith.constant 0 : index
    %7 = vector.load %arg4[%c0_5, %c0_6] : memref<32x128xf32, #tpu.memory_space<vmem>>, vector<32x128xf32>
    %cst_7 = arith.constant dense<0.000000e+00> : vector<8x128xf32>
    %8 = tpu.matmul %6, %7, %cst_7 {dimension_numbers = #tpu.dot_dimension_numbers<[1], [0], [0], [1], [0, 0, 1, 1], [], []>} : vector<8x32xf32>, vector<32x128xf32>, vector<8x128xf32> -> vector<8x128xf32>
    %c0_8 = arith.constant 0 : index
    %c0_9 = arith.constant 0 : index
    %9 = vector.load %arg5[%c0_8, %c0_9] : memref<1x128xf32, #tpu.memory_space<vmem>>, vector<1x128xf32>
    %10 = vector.broadcast %9 : vector<1x128xf32> to vector<8x128xf32>
    %11 = arith.addf %8, %10 : vector<8x128xf32>
    %12 = math.tanh %11 : vector<8x128xf32>
    %cst_10 = arith.constant 1.000000e-01 : f32
    %13 = vector.broadcast %cst_10 : f32 to vector<8x128xf32>
    %14 = arith.mulf %12, %13 : vector<8x128xf32>
    %c0_11 = arith.constant 0 : index
    %c0_12 = arith.constant 0 : index
    %15 = vector.load %arg6[%c0_11, %c0_12] : memref<8x128xf32, #tpu.memory_space<vmem>>, vector<8x128xf32>
    tpu.vector_store %arg6[%c0_11, %c0_12], %14 {strides = array<i32>} : memref<8x128xf32, #tpu.memory_space<vmem>>, vector<8x128xf32>,
    return
  }
  func.func @transform_0(%arg0: i32) -> (i32, i32) {
    %c0_i32 = arith.constant 0 : i32
    %c0_i32_0 = arith.constant 0 : i32
    return %arg0, %c0_i32 : i32, i32
  }
  func.func @transform_1(%arg0: i32) -> (i32, i32) {
    %c0_i32 = arith.constant 0 : i32
    %c0_i32_0 = arith.constant 0 : i32
    %c0_i32_1 = arith.constant 0 : i32
    return %c0_i32, %c0_i32_0 : i32, i32
  }
  func.func @transform_2(%arg0: i32) -> (i32, i32) {
    %c0_i32 = arith.constant 0 : i32
    %c0_i32_0 = arith.constant 0 : i32
    %c0_i32_1 = arith.constant 0 : i32
    return %c0_i32, %c0_i32_0 : i32, i32
  }
  func.func @transform_3(%arg0: i32) -> (i32, i32) {
    %c0_i32 = arith.constant 0 : i32
    %c0_i32_0 = arith.constant 0 : i32
    %c0_i32_1 = arith.constant 0 : i32
    return %c0_i32, %c0_i32_0 : i32, i32
  }
  func.func @transform_4(%arg0: i32) -> (i32, i32) {
    %c0_i32 = arith.constant 0 : i32
    %c0_i32_0 = arith.constant 0 : i32
    %c0_i32_1 = arith.constant 0 : i32
    return %c0_i32, %c0_i32_0 : i32, i32
  }
  func.func @transform_5(%arg0: i32) -> (i32, i32) {
    %c0_i32 = arith.constant 0 : i32
    %c0_i32_0 = arith.constant 0 : i32
    return %arg0, %c0_i32 : i32, i32
  }
}

</mosaic_0001>

<bundles_post_ra>
// kernel: actor_forward.1
= control target key start
LH: loop header
LB: loop body
LE: loop exit
PB: predicated region body
PF: predicated region fallthrough
CT: control target
= control target key end

     0   :  { %v253_v0 = vmov 0.0|0.0   ;;  %vm254_vm0 = vmmov 0   ;;  %v255_v4 = vmov 0.0   ;;  %vm32_vm1 = vcmask 261120   ;;  %s324_s1 = inlined_call_operand.vmem [shape: f32[32,32], index: 1, kind: input, shape index: {}]   ;;  %s325_s0 = inlined_call_operand.vmem [shape: f32[8,32], index: 0, kind: input, shape index: {}]   ;;  %s326_s3 = inlined_call_operand.vmem [shape: f32[32,128], index: 3, kind: input, shape index: {}]   ;;  %s327_s2 = inlined_call_operand.vmem [shape: f32[1,32], index: 2, kind: input, shape index: {}]   ;;  %s328_s4 = inlined_call_operand.vmem [shape: f32[1,128], index: 4, kind: input, shape index: {}]   ;;  %s329_s5 = inlined_call_operand.vmem [shape: f32[8,128], index: 5, kind: output, shape index: {}]  }
   0x1   :  { %234 = vmatprep.subr.bf16.mxu0 %v253_v0  ;;  %v21_v1 = vld [vmem:[%s324_s1] sm:$0xff]  ;;  %v22_v2 = vld [vmem:[%s324_s1 + $0x8] sm:$0xff]  ;;  %v23_v3 = vld [vmem:[%s324_s1 + $0x10] sm:$0xff]  ;;  %220 = vmatprep.mubr.msk.f32.mxu0 %vm254_vm0, %v255_v4 }
   0x2   :  { %v235_v5 = vpack.c.bf16 %v22_v2, %v21_v1  ;;  %v24_v6 = vld [vmem:[%s324_s1 + $0x18] sm:$0xff]  ;;  %240 = vmatprep.subr.bf16.mxu1 %v253_v0  ;;  %231 = vmatprep.mubr.msk.f32.mxu1 %vm254_vm0, %v255_v4  ;;  %v20_v8 = vld [vmem:[%s325_s0] sm:$0xff]  ;;  %v108_v10 = vld [vmem:[%s326_s3 + $0x8] sm:$0xff] }
   0x3   :  { %v238_v7 = vpack.c.bf16 %v24_v6, %v23_v3  ;;  %v107_v9 = vld [vmem:[%s326_s3] sm:$0xff]  ;;  %v109_v11 = vld [vmem:[%s326_s3 + $0x10] sm:$0xff]  ;;  %v110_v13 = vld [vmem:[%s326_s3 + $0x18] sm:$0xff] }
   0x4   :  { %236 = vmatpush3.bf16.msra.mxu0 %v235_v5  ;;  %v241_v12 = vpack.c.bf16 %v108_v10, %v107_v9  ;;  %v244_v14 = vpack.c.bf16 %v110_v13, %v109_v11  ;;  %v198_v15 = vld [vmem:[%s327_s2] ss:$0 sm:$0xff] }
   0x5   :  { %237 = vmatprep.subr.bf16.mxu0 %v253_v0  ;;  %v200_v20 = vld [vmem:[%s328_s4] ss:$0 sm:$0xff] }
   0x6   :  { %242 = vmatpush3.bf16.msra.mxu1 %v241_v12 }
   0x7   :  { %243 = vmatprep.subr.bf16.mxu1 %v253_v0 }
   0x8   :  { %239 = vmatpush3.bf16.msra.mxu0 %v238_v7 }
   0xa   :  { %245 = vmatpush3.bf16.msra.mxu1 %v244_v14 }
   0xb   :  { %221 = vmatmul.mubr.msk.f32.vlgmr.msra.gmra.mrb[0].mxu0 %vm32_vm1, %v20_v8 }
  0xde   :  { %v102_v16 = vpop.f32.mrb[0].mxu0 }
  0xdf   :  { %v103_v17 = vadd.f32 %v198_v15, %v102_v16  ;;  %v222_v18 = vpop.f32.mrb[1].mxu0 }
  0xe1   :  { %249 = vtanh.f32 %v103_v17 }
  0xeb   :  { %v250_v19 = vpop.eup %249 }
  0xec   :  { %232 = vmatmul.mubr.msk.f32.vlgmr.msra.gmra.mrb[0].mxu1 %vm32_vm1, %v250_v19 }
 0x1bf   :  { %v187_v21 = vpop.f32.mrb[0].mxu1 }
 0x1c0   :  { %v188_v22 = vadd.f32 %v200_v20, %v187_v21  ;;  %v233_v23 = vpop.f32.mrb[1].mxu1 }
 0x1c2   :  { %251 = vtanh.f32 %v188_v22 }
 0x1cc   :  { %v252_v24 = vpop.eup %251 }
 0x1cd   :  { %v192_v25 = vmul.f32 0.1, %v252_v24 }
 0x1cf   :  { %193 = vst [vmem:[%s329_s5] sm:$0xff] %v192_v25 }

</bundles_post_ra>
